<compile_context>
chip_gen: v6e
topology: v6e:2x2x1
jax: 0.10.0
libtpu: 0.0.40
codegen_flags: <defaults>
</compile_context>

<pallas_src>
import jax
import jax.numpy as jnp
from jax.experimental import pallas as pl
from jax.experimental.pallas import tpu as pltpu


def se_kernel(x_ref, w1t_ref, w2t_ref, o_ref):
    # x_ref  : (bt, C, HW) float32  batch tile, NCHW-native (HW on lanes)
    # w1t_ref: (C, C_r)    float32  fc1 weight, pre-transposed, pre-scaled by 1/HW
    # w2t_ref: (C_r, C)    float32  fc2 weight, pre-transposed
    # o_ref  : (bt, C, HW) float32
    x = x_ref[...]                                         # (bt, C, HW)

    # squeeze: spatial sum over the lane axis (1/HW already folded into w1t)
    pooled = jnp.sum(x, axis=-1)                           # (bt, C), f32 accumulate

    # excite: fc1 (no bias) + ReLU, fc2 (no bias) + sigmoid
    h = jnp.dot(pooled, w1t_ref[...],
                preferred_element_type=jnp.float32)        # (bt, C_r)
    h = jnp.maximum(h, 0.0)
    logits = jnp.dot(h, w2t_ref[...],
                     preferred_element_type=jnp.float32)   # (bt, C)
    gate = jax.nn.sigmoid(logits)                          # (bt, C)  (exp on EUP)

    # scale: broadcast gate over the spatial (lane) axis; f32 multiply on VPU
    o_ref[...] = (x * gate[:, :, None]).astype(o_ref.dtype)


def _device_vmem_bytes():
    """Physical VMEM per TensorCore, with a safe fallback (v7x = 64 MiB)."""
    try:
        info = pltpu.get_tpu_info()
        cap = getattr(info, "vmem_capacity_bytes", None)
        if cap:
            return int(cap)
    except Exception:
        pass
    return 64 * 1024 * 1024


def squeeze_excite(x_nchw, w1, w2):
    """x_nchw: (B, C, H, W) f32; w1: (C//r, C); w2: (C, C//r) (nn.Linear layout)."""
    B, C, H, W = x_nchw.shape
    HW = H * W
    C_r = w1.shape[0]
    dtype_bytes = jnp.dtype(x_nchw.dtype).itemsize

    # Layout: contiguous reshape only (no transpose, no extra HBM traffic).
    x = x_nchw.reshape(B, C, HW)
    # Pre-transpose weights once; fold the 1/HW of the mean into fc1.
    w1t = (jnp.transpose(w1) * (1.0 / float(HW))).astype(jnp.float32)   # (C, C_r)
    w2t = jnp.transpose(w2).astype(jnp.float32)                         # (C_r, C)

    # --- VMEM budget (generation-aware) and batch-tile selection ------------
    vmem_cap = _device_vmem_bytes()
    # Leave >=16 MiB headroom for Mosaic internal scratch + resident weights;
    # cap at ~100 MiB on 128 MiB chips (v5e/v6e), ~48 MiB on v7x (64 MiB/TC).
    vmem_limit = max(32 * 1024 * 1024,
                     min(vmem_cap - 16 * 1024 * 1024, 100 * 1024 * 1024))

    per_image = C * HW * dtype_bytes
    # Input + output slabs, each double-buffered -> ~4x block bytes live.
    target_block_bytes = min(8 * 1024 * 1024, vmem_limit // 8)
    bt = max(1, min(B, target_block_bytes // max(per_image, 1)))
    # Keep >= 2 grid steps when possible: pipelining overlap everywhere and
    # megacore load balance on v7x (2 TCs).
    if B >= 2 and pl.cdiv(B, bt) < 2:
        bt = max(1, (B + 1) // 2)
    while B % bt != 0:          # avoid partial (padded) batch blocks
        bt -= 1
    grid = (B // bt,)

    out = pl.pallas_call(
        se_kernel,
        out_shape=jax.ShapeDtypeStruct((B, C, HW), x_nchw.dtype),
        grid=grid,
        in_specs=[
            # Batch-tiled activation slab; (C, HW) are full-extent so the
            # (8, 128) block constraint is always satisfied.
            pl.BlockSpec((bt, C, HW), lambda b: (b, 0, 0)),
            # Small weights: constant index_map -> VMEM-resident across steps.
            pl.BlockSpec((C, C_r), lambda b: (0, 0)),
            pl.BlockSpec((C_r, C), lambda b: (0, 0)),
        ],
        out_specs=pl.BlockSpec((bt, C, HW), lambda b: (b, 0, 0)),
        compiler_params=pltpu.CompilerParams(
            dimension_semantics=("parallel",),     # megacore sharding on v7x
            vmem_limit_bytes=int(vmem_limit),
        ),
    )(x, w1t, w2t)

    return out.reshape(B, C, H, W)


def squeeze_excite_ref(x, w1, w2):
    """Pure-JAX reference mirroring the PyTorch forward."""
    y = jnp.mean(x, axis=(2, 3))            # AdaptiveAvgPool2d(1) + view(b, c)
    y = jnp.maximum(y @ w1.T, 0.0)          # fc1 + relu
    y = jax.nn.sigmoid(y @ w2.T)            # fc2 + sigmoid
    return x * y[:, :, None, None]


if __name__ == "__main__":
    # SqueezeExciteBlock(in_channels=32, reduction=16) -> hidden = 2
    B, C, H, W = 2, 32, 8, 8
    reduction = 16
    C_r = C // reduction

    key = jax.random.PRNGKey(0)
    kx, k1, k2 = jax.random.split(key, 3)

    x = jax.random.normal(kx, (B, C, H, W), dtype=jnp.float32)
    # deterministic synthetic weights (shapes per nn.Linear: (out, in))
    w1 = jax.random.normal(k1, (C_r, C), dtype=jnp.float32) * 0.1
    w2 = jax.random.normal(k2, (C, C_r), dtype=jnp.float32) * 0.1

    out = squeeze_excite(x, w1, w2)
    out = jax.block_until_ready(out)

    ref = squeeze_excite_ref(x, w1, w2)
    assert out.shape == (B, C, H, W)
    assert jnp.allclose(out, ref, atol=1e-5, rtol=1e-5), "mismatch vs reference"

    print("KERNEL_OK")
</pallas_src>

<mosaic_0001>
module attributes {stable_mosaic.version = 11 : i64} {
  func.func @se_kernel(%arg0: i32, %arg1: memref<1x32x64xf32, #tpu.memory_space<vmem>>, %arg2: memref<32x2xf32, #tpu.memory_space<vmem>>, %arg3: memref<2x32xf32, #tpu.memory_space<vmem>>, %arg4: memref<1x32x64xf32, #tpu.memory_space<vmem>>) attributes {dimension_semantics = [#tpu.dimension_semantics<parallel>], iteration_bounds = array<i64: 2>, scalar_prefetch = 0 : i64, scratch_operands = 0 : i64, tpu.core_type = #tpu.core_type<tc>, window_params = [{transform_indices = @transform_0, window_bounds = array<i64: 1, 32, 64>}, {pipeline_mode = #tpu.pipeline_mode<synchronous>, transform_indices = @transform_1, window_bounds = array<i64: 32, 2>}, {pipeline_mode = #tpu.pipeline_mode<synchronous>, transform_indices = @transform_2, window_bounds = array<i64: 2, 32>}, {transform_indices = @transform_3, window_bounds = array<i64: 1, 32, 64>}]} {
    %c0 = arith.constant 0 : index
    %c0_0 = arith.constant 0 : index
    %c0_1 = arith.constant 0 : index
    %0 = vector.load %arg1[%c0, %c0_0, %c0_1] : memref<1x32x64xf32, #tpu.memory_space<vmem>>, vector<1x32x64xf32>
    %cst = arith.constant dense<0.000000e+00> : vector<1x32xf32>
    %1 = vector.multi_reduction <add>, %0, %cst [2] : vector<1x32x64xf32> to vector<1x32xf32>
    %c0_2 = arith.constant 0 : index
    %c0_3 = arith.constant 0 : index
    %2 = vector.load %arg2[%c0_2, %c0_3] : memref<32x2xf32, #tpu.memory_space<vmem>>, vector<32x2xf32>
    %cst_4 = arith.constant dense<0.000000e+00> : vector<1x2xf32>
    %3 = tpu.matmul %1, %2, %cst_4 {dimension_numbers = #tpu.dot_dimension_numbers<[1], [0], [0], [1], [0, 0, 1, 1], [], []>} : vector<1x32xf32>, vector<32x2xf32>, vector<1x2xf32> -> vector<1x2xf32>
    %cst_5 = arith.constant 0.000000e+00 : f32
    %4 = vector.broadcast %cst_5 : f32 to vector<1x2xf32>
    %5 = arith.maximumf %3, %4 : vector<1x2xf32>
    %c0_6 = arith.constant 0 : index
    %c0_7 = arith.constant 0 : index
    %6 = vector.load %arg3[%c0_6, %c0_7] : memref<2x32xf32, #tpu.memory_space<vmem>>, vector<2x32xf32>
    %cst_8 = arith.constant dense<0.000000e+00> : vector<1x32xf32>
    %7 = tpu.matmul %5, %6, %cst_8 {dimension_numbers = #tpu.dot_dimension_numbers<[1], [0], [0], [1], [0, 0, 1, 1], [], []>} : vector<1x2xf32>, vector<2x32xf32>, vector<1x32xf32> -> vector<1x32xf32>
    %8 = arith.negf %7 : vector<1x32xf32>
    %9 = math.exp %8 : vector<1x32xf32>
    %cst_9 = arith.constant 1.000000e+00 : f32
    %10 = vector.broadcast %cst_9 : f32 to vector<1x32xf32>
    %11 = arith.addf %10, %9 : vector<1x32xf32>
    %12 = arith.divf %10, %11 : vector<1x32xf32>
    %13 = vector.shape_cast %12 : vector<1x32xf32> to vector<1x32x1xf32>
    %14 = vector.broadcast %13 : vector<1x32x1xf32> to vector<1x32x64xf32>
    %15 = arith.mulf %0, %14 : vector<1x32x64xf32>
    %c0_10 = arith.constant 0 : index
    %c0_11 = arith.constant 0 : index
    %c0_12 = arith.constant 0 : index
    %16 = vector.load %arg4[%c0_10, %c0_11, %c0_12] : memref<1x32x64xf32, #tpu.memory_space<vmem>>, vector<1x32x64xf32>
    tpu.vector_store %arg4[%c0_10, %c0_11, %c0_12], %15 {strides = array<i32>} : memref<1x32x64xf32, #tpu.memory_space<vmem>>, vector<1x32x64xf32>,
    return
  }
  func.func @transform_0(%arg0: i32) -> (i32, i32, i32) {
    %c0_i32 = arith.constant 0 : i32
    %c0_i32_0 = arith.constant 0 : i32
    %c0_i32_1 = arith.constant 0 : i32
    return %arg0, %c0_i32, %c0_i32_0 : i32, i32, i32
  }
  func.func @transform_1(%arg0: i32) -> (i32, i32) {
    %c0_i32 = arith.constant 0 : i32
    %c0_i32_0 = arith.constant 0 : i32
    %c0_i32_1 = arith.constant 0 : i32
    return %c0_i32, %c0_i32_0 : i32, i32
  }
  func.func @transform_2(%arg0: i32) -> (i32, i32) {
    %c0_i32 = arith.constant 0 : i32
    %c0_i32_0 = arith.constant 0 : i32
    %c0_i32_1 = arith.constant 0 : i32
    return %c0_i32, %c0_i32_0 : i32, i32
  }
  func.func @transform_3(%arg0: i32) -> (i32, i32, i32) {
    %c0_i32 = arith.constant 0 : i32
    %c0_i32_0 = arith.constant 0 : i32
    %c0_i32_1 = arith.constant 0 : i32
    return %arg0, %c0_i32, %c0_i32_0 : i32, i32, i32
  }
}

</mosaic_0001>

<bundles_post_ra>
// kernel: tpu_custom_call.1
= control target key start
LH: loop header
LB: loop body
LE: loop exit
PB: predicated region body
PF: predicated region fallthrough
CT: control target
= control target key end

     0   :  { %8 = vsyncpa [#allocation3], 0  ;;  %s932_s0 = inlined_call_operand.hbm [shape: f32[2,32,64], index: 0, kind: input, shape index: {}]   ;;  %s933_s1 = inlined_call_operand.vmem [shape: f32[32,2], index: 1, kind: input, shape index: {}]   ;;  %s934_s2 = inlined_call_operand.vmem [shape: f32[2,32], index: 2, kind: input, shape index: {}]   ;;  %s935_s3 = inlined_call_operand.hbm [shape: f32[2,32,64], index: 3, kind: output, shape index: {}]  }
   0x1   :  { %10 = vsyncpa [#allocation3 + $0x1], 0 }
   0x2   :  { %11 = vsyncpa [#allocation4], 0 }
   0x3   :  { %13 = vsyncpa [#allocation4 + $0x1], 0  ;;  %s735_s12 = smov 0   ;;  %s737_s13 = smov 0  }
   0x4   :  { %s739_s14 = smov 0   ;;  %s741_s15 = smov 0  }
   0x5 LB: > { %s756_s16 = sadd.s32 4294967295, %s705_s15   ;;  %s514_s17 = sadd.s32 4294967294, %s705_s15   ;;  %s705_s15 = sphi %s741_s15, %s950_s15   ;;  %s701_s14 = sphi %s739_s14, %s949_s14   ;;  %s697_s13 = sphi %s737_s13, %s948_s13   ;;  %s693_s12 = sphi %s735_s12, %s947_s12  }
   0x6   : > { %s760_s18 = sadd.s32 1, %s705_s15   ;;  %s26_s19 = sadd.s32 1, %s701_s14 }
   0x7   : > { %s23_s20 = ssub.s32 %s705_s15, %s760_s18  ;;  %p33_p0 = scmp.ne.s32.totalorder %s701_s14, %s697_s13 }
   0x8   : > { %p24_p1 = scmp.eq.s32.totalorder %s23_s20, 0  ;;  %p34_p2 = scmp.eq.s32.totalorder %s705_s15, 0 }
   0x9   : > { %p39_p3 = scmp.ne.s32.totalorder %s697_s13, %s693_s12  ;;  %p40_p4 = scmp.eq.s32.totalorder %s756_s16, 0 }
   0xa   : > { %s772_s21 = scalar_select %p24_p1, %s701_s14, %s26_s19  }
   0xb   : > { %p774_p5 = por %p34_p2, %p33_p0  ;;  %p778_p6 = por %p40_p4, %p39_p3 }
   0xc   : > { %p105_p7 = scmp.eq.s32.totalorder %s756_s16, 1  ;;  %p111_p8 = scmp.eq.s32.totalorder %s514_s17, 1 }
   0xd   : > { %s939_s23 = scalar_select %p778_p6, 1, 0 }
   0xe   : > { %p569_p10 = scmp.lt.s32.totalorder %s705_s15, 2  ;;  %p785_p11 = por %p105_p7, %p33_p0 }
   0xf   : > { %p789_p12 = por %p111_p8, %p39_p3  ;;  %s137_s26 = sand.u32 1, %s701_s14  }
  0x10   : > { %s940_s24 = scalar_select %p785_p11, 1, 0 }
  0x11   : > { %s941_s25 = scalar_select %p789_p12, 1, 0 }
  0x12   : > { %s532_s27 = sshll.u32 %s705_s15, 9  ;;  %s517_s28 = sshll.u32 %s137_s26, 5 }
  0x13   : > { %s798_s4 = scalar_lea.hbm %s932_s0, %s532_s27  ;;  %s141_s5 = scalar_lea.vmem [#allocation2], %s517_s28 }
  0x14   : > { %s148_s6 = sshll.u32 %s141_s5, 4  ;;  %p802_p13 = pnand %p569_p10, %p774_p5  ;;  %s806_s6 = int_to_ptr.vmem [resolvable:$true] %s148_s6 }
  0x15   : > { %s808_s8 = scalar_lea.sflag [#allocation3], %s137_s26  ;;  %s613_s9 = scalar_lea.hbm %s798_s4, 512 }
  0x16   : > { %p614_p0 = scmp.ne.s32.totalorder %s798_s4, %s613_s9  ;;  %p615_p1 = pneg %p802_p13 }
  0x17   : > { %s618_s17 = scalar_lea.hbm %s932_s0, 1024  ;;  %p619_p4 = scmp.lt.s32.totalorder %s798_s4, %s932_s0 }
  0x18   : > { %p616_p2 = pnand %p615_p1, %p614_p0  ;;  %p620_p5 = scmp.lt.s32.totalorder %s618_s17, %s613_s9 }
  0x1a   : > { %p617_p3 = pneg %p616_p2  ;;  %p621_p7 = por %p620_p5, %p619_p4 }
  0x1c   : > { %p622_p8 = pnand %p621_p7, %p617_p3 }
  0x1e   : > { %625 = shalt.err (!%p622_p8)
}
  0x1f   : > { %s626_s22 = scalar_lea.vmem %s806_s6, 512  ;;  %s707_s26 = smov [#allocation2]  }
  0x20   : > { %p627_p10 = scmp.ne.s32.totalorder %s806_s6, %s626_s22  ;;  %s631_s27 = sshll.u32 %s707_s26, 4  ;;  %s632_s27 = int_to_ptr.vmem [resolvable:$false] %s631_s27 }
  0x21   : > { %s633_s28 = scalar_lea.vmem %s632_s27, 1024  ;;  %p634_p2 = scmp.lt.s32.totalorder %s806_s6, %s632_s27 }
  0x22   : > { %p629_p9 = pnand %p627_p10, %p615_p1  ;;  %p635_p12 = scmp.lt.s32.totalorder %s633_s28, %s626_s22 }
  0x24   : > { %p630_p0 = pneg %p629_p9  ;;  %p636_p11 = por %p635_p12, %p634_p2 }
  0x26   : > { %p637_p6 = pnand %p636_p11, %p630_p0 }
  0x28   : > { %640 = shalt.err (!%p637_p6)
}
  0x29   : > { %s708_s29 = smov 128   ;;  %s709_s30 = smov 8  }
  0x2a   : > { %564 = dma.hbm_to_vmem [thread:$0]  (!%p802_p13), %s798_s4, 512, %s806_s6, %s808_s8, %s708_s29, %s708_s29, %s709_s30  }
  0x2b   : > { %p520_p9 = scmp.ge.s32.totalorder %s705_s15, 1  ;;  %p156_p1 = scmp.lt.s32.totalorder %s705_s15, 3 }
  0x2d   : > { %p157_p3 = pnand %p520_p9, %p156_p1 }
  0x2e   : > { %s832_s5 = sand.u32 (!%p157_p3), 1, %s697_s13   ;;  %p943_p6 = scmp.ne.s32.totalorder (!%p157_p3), %s939_s23, 0 }
  0x2f   : > { %160 = sbr.rel (%p157_p3) target bundleno = 763 (0x2fb), region = 32  ;;  %s521_s9 = sshll.u32 (!%p157_p3), %s832_s5, 5 }
  0x30   : > { %s163_s10 = scalar_lea.sflag (!%p157_p3), [#allocation3], %s832_s5  ;;  %s166_s11 = scalar_lea.vmem (!%p157_p3), [#allocation2], %s521_s9 }
  0x34   : > { %684 = dma.done.wait (%p943_p6), %s163_s10, 512  }
  0x35   : > { %686 = vsyncadd (%p943_p6), %s163_s10, 4294966784  ;;  %vm193_vm0 = vcmask 523264   ;;  %v842_v0 = vld [vmem:[%s166_s11] sm:$0xff]  ;;  %v844_v1 = vld [vmem:[%s166_s11 + $0x10] sm:$0xff]  ;;  %v710_v9 = vmov 0.0   ;;  %vm711_vm1 = vmmov 0   ;;  %v214_v13 = vlaneseq }
  0x36   : > { %v846_v2 = vld [vmem:[%s166_s11 + $0x8] sm:$0xff]  ;;  %v194_v3 = vsel %vm193_vm0, %v842_v0, 0.0  ;;  %v200_v4 = vsel %vm193_vm0, %v844_v1, 0.0  ;;  %v852_v5 = vld [vmem:[%s166_s11 + $0x18] sm:$0xff]  ;;  %541 = vmatprep.subr.mxu0 %v710_v9  ;;  %552 = vmatprep.subr.mxu1 %v710_v9  ;;  %v208_v10 = vld [vmem:[%s933_s1 + $0x10] sm:$0xff]  ;;  %vm225_vm2 = vcmask 130112  }
  0x37   : > { %195 = vadd.xlane.f32.xlu0 %v194_v3  ;;  %201 = vadd.xlane.f32.xlu1 %v200_v4  ;;  %v197_v6 = vsel %vm193_vm0, %v846_v2, 0.0  ;;  %v203_v7 = vsel %vm193_vm0, %v852_v5, 0.0  ;;  %v209_v8 = vld [vmem:[%s933_s1 + $0x18] sm:$0xff]  ;;  %v207_v11 = vld [vmem:[%s933_s1 + $0x8] sm:$0xff]  ;;  %v206_v12 = vld [vmem:[%s933_s1] sm:$0xff]  ;;  %v215_v14 = vand.u32 127, %v214_v13 }
  0x38   : > { %542 = vmatpush3.msra.mxu0 %v209_v8  ;;  %549 = vmatprep.mubr.msk.f32.mxu0 %vm711_vm1, %v710_v9  ;;  %v217_v15 = vshrl.u32 %v214_v13, 7  ;;  %vm232_vm3 = vcmask 195712   ;;  %vm239_vm4 = vcmask 261312   ;;  %vm241_vm5 = vcmask 261120   ;;  %v315_v34 = vld [vmem:[%s934_s2] sm:$0x3] }
  0x39   : > { %543 = vmatprep.subr.mxu0 %v710_v9  ;;  %554 = vmatprep.mubr.msk.f32.mxu1 %vm711_vm1, %v710_v9  ;;  %v220_v16 = vadd.s32 4294967288, %v215_v14  ;;  %v234_v17 = vadd.s32 4294967272, %v215_v14  ;;  %v227_v18 = vadd.s32 4294967280, %v215_v14  ;;  %vm320_vm6 = vcmask 1041408   ;;  %s188_s27 = scalar_lea.vmem [#allocation5], %s521_s9  ;;  %s533_s29 = sshll.u32 %s756_s16, 9 }
  0x3a   : > { %544 = vmatpush3.msra.mxu0 %v208_v10  ;;  %v218_v21 = vsub.s32 %v215_v14, %v217_v15  ;;  %553 = vmatpush3.msk.msra.mxu1 %vm320_vm6, %v315_v34  ;;  %vm316_vm7 = vcmask 15360   ;;  %v402_v43 = vsub.s32 0, %v217_v15  ;;  %s441_s28 = sshll.u32 %s188_s27, 4  ;;  %s887_s10 = scalar_lea.hbm %s935_s3, %s533_s29  ;;  %s881_s28 = int_to_ptr.vmem [resolvable:$true] %s441_s28 }
  0x3b   : > { %198 = vadd.xlane.f32.xlu0 %v197_v6  ;;  %204 = vadd.xlane.f32.xlu1 %v203_v7  ;;  %v223_v22 = vsub.s32 %v220_v16, %v217_v15  ;;  %v237_v23 = vsub.s32 %v234_v17, %v217_v15  ;;  %v230_v24 = vsub.s32 %v227_v18, %v217_v15  ;;  %s428_s11 = scalar_lea.sflag [#allocation4], %s832_s5  ;;  %s641_s23 = scalar_lea.vmem %s881_s28, 512 }
  0x3c   : > { %545 = vmatprep.subr.mxu0 %v710_v9  ;;  %p642_p11 = scmp.ne.s32.totalorder %s881_s28, %s641_s23  ;;  %p944_p12 = scmp.ne.s32.totalorder %s940_s24, 0 }
  0x3d   : > { %546 = vmatpush3.msra.mxu0 %v207_v11  ;;  %s712_s16 = smov [#allocation5]  }
  0x3e   : > { %547 = vmatprep.subr.mxu0 %v710_v9  ;;  %p643_p13 = pnand %p642_p11, %p944_p12  ;;  %s645_s4 = sshll.u32 %s712_s16, 4  ;;  %s646_s4 = int_to_ptr.vmem [resolvable:$false] %s645_s4 }
  0x3f   : > { %548 = vmatpush3.msra.mxu0 %v206_v12  ;;  %s647_s6 = scalar_lea.vmem %s646_s4, 1024  ;;  %p648_p5 = scmp.lt.s32.totalorder %s881_s28, %s646_s4 }
  0x40   : > { %p644_p4 = pneg %p643_p13  ;;  %p649_p7 = scmp.lt.s32.totalorder %s647_s6, %s641_s23 }
  0x42   : > { %p650_p8 = por %p649_p7, %p648_p5 }
  0x44   : > { %p651_p10 = pnand %p650_p8, %p644_p4 }
  0xc0   : > { %v196_v19 = vpop.xlane.xlu0 %195  ;;  %v202_v20 = vpop.xlane.xlu1 %201 }
  0xc1   : > { %v219_v27 = vrot.slane %v196_v19, %v218_v21  ;;  %v231_v30 = vrot.slane %v202_v20, %v230_v24 }
  0xc4   : > { %v199_v25 = vpop.xlane.xlu0 %198  ;;  %v205_v26 = vpop.xlane.xlu1 %204 }
  0xc5   : > { %v224_v28 = vrot.slane %v199_v25, %v223_v22  ;;  %v238_v29 = vrot.slane %v205_v26, %v237_v23 }
  0xc7   : > { %v226_v31 = vsel %vm225_vm2, %v224_v28, %v219_v27 }
  0xc8   : > { %v233_v32 = vsel %vm232_vm3, %v231_v30, %v226_v31 }
  0xc9   : > { %v240_v33 = vsel %vm239_vm4, %v238_v29, %v233_v32 }
  0xca   : > { %550 = vmatmul.mubr.msk.f32.vlgmr.msra.gmra.mxu0 %vm241_vm5, %v240_v33 }
 0x18a   : > { %v310_v35 = vpop.f32.mrf.mxu0 }
 0x18b   : > { %v314_v36 = vmax.f32 %v310_v35, 0.0 }
 0x18c   : > { %v551_v37 = vpop.f32.mrf.mxu0 }
 0x18d   : > { %555 = vmatmul.mubr.msk.f32.vlgmr.msra.gmra.mxu1 %vm316_vm7, %v314_v36 }
 0x24d   : > { %v390_v38 = vpop.f32.mrf.mxu1 }
 0x24e   : > { %v526_v39 = vmul.f32 -1.442695, %v390_v38 }
 0x24f   : > { %v556_v40 = vpop.f32.mrf.mxu1 }
 0x250   : > { %609 = vpow2.f32 %v526_v39 }
 0x25d   : > { %v610_v41 = vpop.eup %609 }
 0x25e   : > { %v397_v42 = vadd.f32 1.0, %v610_v41 }
 0x260   : > { %611 = vrcp.f32 %v397_v42 }
 0x26d   : > { %v612_v44 = vpop.eup %611 }
 0x26e   : > { %v403_v45 = vrot.slane %v612_v44, %v402_v43 }
 0x270   : > { %409 = vbcast.lane.b32.xlu1 %v403_v45, 264  ;;  %405 = vbcast.lane.b32.xlu0 %v403_v45, 256 }
 0x274   : > { %413 = vbcast.lane.b32.xlu1 %v403_v45, 272 }
 0x278   : > { %417 = vbcast.lane.b32.xlu1 %v403_v45, 280 }
 0x2e2   : > { %v410_v46 = vpop.permute.xlu1 %409  ;;  %v406_v47 = vpop.permute.xlu0 %405 }
 0x2e3   : > { %v420_v48 = vmul.f32 %v410_v46, %v846_v2  ;;  %v419_v49 = vmul.f32 %v406_v47, %v842_v0 }
 0x2e5   : > { %424 = vst.msk [vmem:[%s188_s27 + $0x8] sm:$0xff] %vm193_vm0, %v420_v48  ;;  %423 = vst.msk [vmem:[%s188_s27] sm:$0xff] %vm193_vm0, %v419_v49 }
 0x2e6   : > { %v414_v50 = vpop.permute.xlu1 %413 }
 0x2e7   : > { %v421_v51 = vmul.f32 %v414_v50, %v844_v1 }
 0x2e9   : > { %425 = vst.msk [vmem:[%s188_s27 + $0x10] sm:$0xff] %vm193_vm0, %v421_v51 }
 0x2ea   : > { %v418_v52 = vpop.permute.xlu1 %417 }
 0x2eb   : > { %v422_v53 = vmul.f32 %v418_v52, %v852_v5 }
 0x2ed   : > { %426 = vst.msk [vmem:[%s188_s27 + $0x18] sm:$0xff] %vm193_vm0, %v422_v53 }
 0x2ee   : > { %654 = shalt.err (!%p651_p10)
}
 0x2ef   : > { %s655_s7 = scalar_lea.hbm %s887_s10, 512  ;;  %s659_s19 = scalar_lea.hbm %s935_s3, 1024 }
 0x2f0   : > { %p656_p0 = scmp.ne.s32.totalorder %s887_s10, %s655_s7  ;;  %p660_p1 = scmp.lt.s32.totalorder %s887_s10, %s935_s3 }
 0x2f1   : > { %p661_p3 = scmp.lt.s32.totalorder %s659_s19, %s655_s7 }
 0x2f2   : > { %p657_p2 = pnand %p656_p0, %p944_p12 }
 0x2f3   : > { %p662_p6 = por %p661_p3, %p660_p1 }
 0x2f4   : > { %p658_p9 = pneg %p657_p2 }
 0x2f6   : > { %p663_p11 = pnand %p662_p6, %p658_p9 }
 0x2f8   : > { %666 = shalt.err (!%p663_p11)
}
 0x2f9   : > { %s713_s26 = smov 128   ;;  %s714_s27 = smov 8  }
 0x2fa   : > { %559 = dma.vmem_to_hbm [thread:$0]  (%p944_p12), %s881_s28, 512, %s887_s10, %s428_s11, %s713_s26, %s713_s26, %s714_s27  }
 0x2fb PF: > { %s456_s29 = sand.u32 1, %s693_s12   ;;  %p945_p13 = scmp.ne.s32.totalorder %s941_s25, 0 }
 0x2fc   : > { %p946_p4 = scmp.ge.s32.totalorder %s705_s15, 2  ;;  %s457_s30 = scalar_lea.sflag [#allocation4], %s456_s29 }
 0x2fe   : > { %p566_p5 = pnand %p946_p4, %p945_p13 }
 0x300   : > { %p567_p7 = pneg %p566_p5 }
 0x302   : > { %688 = dma.done.wait (%p567_p7), %s457_s30, 512  }
 0x303   : > { %690 = vsyncadd (%p567_p7), %s457_s30, 4294966784  ;;  %p16_p8 = scmp.ge.s32.totalorder %s760_s18, 4   ;;  %s947_s12 = smov %s697_s13 }
 0x304   : > { %s948_s13 = smov %s701_s14  ;;  %s949_s14 = smov %s772_s21 }
 0x305   : > { %s950_s15 = smov %s760_s18  ;;  %18 = sbr.rel (!%p16_p8) target bundleno = 5 (0x5), region = 77 }
 0x30a   :  { %462 = vsyncpa [#allocation3], 1 }
 0x30b   :  { %464 = vsyncpa [#allocation3 + $0x1], 1 }
 0x30c   :  { %465 = vsyncpa [#allocation4], 1 }
 0x30d   :  { %467 = vsyncpa [#allocation4 + $0x1], 1 }

</bundles_post_ra>
